<compile_context>
chip_gen: v7x
topology: tpu7x:2x2x1
jax: 0.10.0
libtpu: 0.0.40
codegen_flags: <defaults>
</compile_context>

<pallas_src>
import math
import jax
import jax.numpy as jnp
from jax.experimental import pallas as pl
from jax.experimental.pallas import tpu as pltpu


def _round_up(x: int, m: int) -> int:
    return ((x + m - 1) // m) * m


def _pick_tq(n_queries: int) -> int:
    """Query rows per grid step: 128 on v7x (2 TCs), 256 on single-TC chips."""
    try:
        kind = jax.devices()[0].device_kind.lower()
    except Exception:  # pragma: no cover - defensive
        kind = ""
    base = 128 if "v7" in kind else 256
    return min(base, _round_up(max(n_queries, 1), 8))


def _masked_layer_norm(x, gamma, beta, outdim: int, o_pad: int, eps: float = 1e-5):
    """LayerNorm over the true `outdim` columns of a lane-padded [R, o_pad] tile.

    Assumes padded columns of `x` are exactly zero and gamma/beta are zero in
    the padded columns (so the output is exactly zero there too).
    """
    inv_o = 1.0 / outdim
    col_mask = jax.lax.broadcasted_iota(jnp.int32, (1, o_pad), 1) < outdim
    mu = jnp.sum(x, axis=-1, keepdims=True) * inv_o      # padded cols are 0
    xc = x - mu
    var = jnp.sum(jnp.where(col_mask, xc * xc, 0.0), axis=-1, keepdims=True) * inv_o
    return xc * jax.lax.rsqrt(var + eps) * gamma + beta


def _make_support_kernel(outdim: int, o_pad: int, eps: float = 1e-5):
    """One-shot kernel: sk_n = LN(k_linear(support)), sv = v_linear(support)."""

    def support_kernel(s_ref, wkv_ref, bkv_ref, gamma_ref, beta_ref,
                       skn_ref, sv_ref):
        proj_s = jnp.dot(s_ref[...], wkv_ref[...],
                         preferred_element_type=jnp.float32) + bkv_ref[...]
        sk = proj_s[:, :o_pad]                 # k_linear(support)  [Ns, Op]
        # Narrow sv to bf16 immediately (it is only consumed by a bf16 matmul).
        sv_ref[...] = proj_s[:, o_pad:].astype(sv_ref.dtype)
        sk_n = _masked_layer_norm(sk, gamma_ref[...], beta_ref[...],
                                  outdim, o_pad, eps)
        skn_ref[...] = sk_n.astype(skn_ref.dtype)

    return support_kernel


def _make_query_kernel(outdim: int, o_pad: int, eps: float = 1e-5):
    """Per-query-tile kernel: projections, LN, softmax attention, prototypes."""

    def query_kernel(q_ref, wqv_ref, bqv_ref, gq_ref, bq_ref,
                     skn_ref, sv_ref, qproto_ref, cproto_ref):
        # Fused [q_linear | v_linear] projection: one 256-lane-wide MXU pass.
        proj_q = jnp.dot(q_ref[...], wqv_ref[...],
                         preferred_element_type=jnp.float32) + bqv_ref[...]
        qq = proj_q[:, :o_pad]                 # q_linear(queries)  [TQ, Op]
        qv = proj_q[:, o_pad:]                 # v_linear(queries)  [TQ, Op]

        # q_prototype = v_linear(queries) (padded columns are exactly 0).
        qproto_ref[...] = qv.astype(qproto_ref.dtype)

        # gamma_q/beta_q already include the 1/sqrt(outdim) score scaling.
        qq_n = _masked_layer_norm(qq, gq_ref[...], bq_ref[...],
                                  outdim, o_pad, eps)

        # Scores: contract the last axes of both operands (no XLU transpose).
        scores = jax.lax.dot_general(
            qq_n.astype(jnp.bfloat16), skn_ref[...],
            dimension_numbers=(((1,), (1,)), ((), ())),
            preferred_element_type=jnp.float32)          # [TQ, Ns]

        # Softmax over the support axis (dim=1).
        m = jnp.max(scores, axis=-1, keepdims=True)
        e = jnp.exp(scores - m)
        denom = jnp.sum(e, axis=-1, keepdims=True)
        affinity = e * pl.reciprocal(denom, approx=True)

        # class_prototype = affinity @ v_linear(support)
        cproto_ref[...] = jnp.dot(
            affinity.astype(jnp.bfloat16), sv_ref[...],
            preferred_element_type=jnp.float32).astype(cproto_ref.dtype)

    # TODO(synk): for very large n_support, switch to a flash-style online
    # softmax over support tiles (second "arbitrary" grid axis + running
    # max/sum scratch) to bound the f32 [TQ, Ns] working set, with a lower
    # threshold on v7x (64 MiB VMEM).
    return query_kernel


def _vmem_limit(resident_bytes: int, pipelined_bytes: int, interm_bytes: int) -> int:
    """Explicit scoped-VMEM limit: resident (x1) + pipelined (x2) + f32 temps."""
    need = resident_bytes + 2 * pipelined_bytes + interm_bytes
    need = int(need * 1.25) + (1 << 20)          # headroom for compiler scratch
    return max(32 * 1024 * 1024, min(need, 64 * 1024 * 1024))


def aen_forward(support_set, queries, params, outdim):
    """Training-mode AEN forward. Returns (q_prototype, class_prototype)."""
    n_support, d_model = support_set.shape
    n_queries, _ = queries.shape

    # --- lane-dense padded layout -----------------------------------------
    d_pad = _round_up(d_model, 128)
    o_pad = _round_up(outdim, 128)
    tq = _pick_tq(n_queries)
    nq_pad = _round_up(n_queries, tq)
    num_tiles = nq_pad // tq

    s_p = jnp.pad(support_set,
                  ((0, 0), (0, d_pad - d_model))).astype(jnp.bfloat16)
    q_p = jnp.pad(queries,
                  ((0, nq_pad - n_queries), (0, d_pad - d_model))).astype(jnp.bfloat16)

    def pad_w(w):   # [D, O] -> [Dp, Op], zero-padded, bf16 for the MXU
        return jnp.pad(w, ((0, d_pad - d_model), (0, o_pad - outdim))).astype(jnp.bfloat16)

    def pad_b(b):   # [1, O] -> [1, Op], zero-padded, f32 (added post-accum)
        return jnp.pad(b, ((0, 0), (0, o_pad - outdim))).astype(jnp.float32)

    # Query-side fused weight [wq | wv]; support-side fused weight [wk | wv].
    # Each projection matrix crosses HBM exactly once per forward call.
    w_qv = jnp.concatenate([pad_w(params["wq"]), pad_w(params["wv"])], axis=1)
    b_qv = jnp.concatenate([pad_b(params["bq"]), pad_b(params["bv"])], axis=1)
    w_kv = jnp.concatenate([pad_w(params["wk"]), pad_w(params["wv"])], axis=1)
    b_kv = jnp.concatenate([pad_b(params["bk"]), pad_b(params["bv"])], axis=1)
    gamma_p = pad_b(params["ln_gamma"])   # zeros in padded cols kill them in LN
    beta_p = pad_b(params["ln_beta"])
    inv_scale = 1.0 / math.sqrt(outdim)
    gamma_q = gamma_p * inv_scale         # fold 1/sqrt(outdim) into query LN
    beta_q = beta_p * inv_scale

    # === stage 1: support-side projection + LayerNorm (computed ONCE) ======
    sup_resident = 0
    sup_pipelined = (s_p.size + w_kv.size) * 2 + (b_kv.size + gamma_p.size
                                                  + beta_p.size) * 4 \
        + 2 * n_support * o_pad * 2
    sup_interm = n_support * (2 * o_pad) * 4 + 2 * n_support * o_pad * 4
    cost_sup = pl.CostEstimate(
        flops=int(2 * n_support * d_pad * (2 * o_pad)),
        transcendentals=int(n_support),
        bytes_accessed=int(sup_pipelined),
    )

    fixed = lambda i: (0, 0)
    skn_p, sv_p = pl.pallas_call(
        _make_support_kernel(outdim, o_pad),
        out_shape=(
            jax.ShapeDtypeStruct((n_support, o_pad), jnp.bfloat16),
            jax.ShapeDtypeStruct((n_support, o_pad), jnp.bfloat16),
        ),
        grid_spec=pltpu.PrefetchScalarGridSpec(
            num_scalar_prefetch=0,
            grid=(1,),
            in_specs=[
                pl.BlockSpec((n_support, d_pad), fixed),     # support set
                pl.BlockSpec((d_pad, 2 * o_pad), fixed),     # W_kv
                pl.BlockSpec((1, 2 * o_pad), fixed),         # b_kv
                pl.BlockSpec((1, o_pad), fixed),             # LN gamma
                pl.BlockSpec((1, o_pad), fixed),             # LN beta
            ],
            out_specs=[
                pl.BlockSpec((n_support, o_pad), fixed),     # sk_n (bf16)
                pl.BlockSpec((n_support, o_pad), fixed),     # sv   (bf16)
            ],
        ),
        compiler_params=pltpu.CompilerParams(
            dimension_semantics=("arbitrary",),
            vmem_limit_bytes=_vmem_limit(sup_resident, sup_pipelined, sup_interm)),
        cost_estimate=cost_sup,
    )(s_p, w_kv, b_kv, gamma_p, beta_p)

    # === stage 2: per-query-tile attention ==================================
    resident_bytes = (w_qv.size * 2
                      + (b_qv.size + gamma_q.size + beta_q.size) * 4
                      + 2 * n_support * o_pad * 2)            # sk_n + sv bf16
    pipelined_bytes = tq * d_pad * 2 + 2 * tq * o_pad * 4     # q tile + 2 outputs
    interm_bytes = (tq * 2 * o_pad * 4                        # proj_q f32
                    + 4 * tq * o_pad * 4                      # qq/qv/qq_n temps
                    + 3 * tq * max(n_support, 128) * 4)       # scores/e/affinity
    proj_flops = 2 * nq_pad * d_pad * (2 * o_pad)
    attn_flops = 2 * nq_pad * n_support * o_pad * 2
    cost_main = pl.CostEstimate(
        flops=int(proj_flops + attn_flops),
        transcendentals=int(nq_pad * (n_support + 2)),
        bytes_accessed=int(q_p.size * 2 + resident_bytes
                           + 2 * nq_pad * o_pad * 4),
    )

    resident = lambda qi: (0, 0)          # weights / LN params / sk_n / sv stay put
    per_tile = lambda qi: (qi, 0)         # query tile + outputs move with the grid

    def res_spec(shape):
        # Constant index_map -> fetched once; single-buffer to halve VMEM use.
        return pl.BlockSpec(shape, resident, pipeline_mode=pl.Buffered(1))

    q_proto_p, c_proto_p = pl.pallas_call(
        _make_query_kernel(outdim, o_pad),
        out_shape=(
            jax.ShapeDtypeStruct((nq_pad, o_pad), jnp.float32),
            jax.ShapeDtypeStruct((nq_pad, o_pad), jnp.float32),
        ),
        grid_spec=pltpu.PrefetchScalarGridSpec(
            num_scalar_prefetch=0,
            grid=(num_tiles,),
            in_specs=[
                pl.BlockSpec((tq, d_pad), per_tile),          # query tile
                res_spec((d_pad, 2 * o_pad)),                 # W_qv
                res_spec((1, 2 * o_pad)),                     # b_qv
                res_spec((1, o_pad)),                         # gamma_q (pre-scaled)
                res_spec((1, o_pad)),                         # beta_q  (pre-scaled)
                res_spec((n_support, o_pad)),                 # sk_n (bf16)
                res_spec((n_support, o_pad)),                 # sv   (bf16)
            ],
            out_specs=[
                pl.BlockSpec((tq, o_pad), per_tile),          # q_prototype
                pl.BlockSpec((tq, o_pad), per_tile),          # class_prototype
            ],
        ),
        compiler_params=pltpu.CompilerParams(
            dimension_semantics=("parallel",),
            vmem_limit_bytes=_vmem_limit(resident_bytes, pipelined_bytes,
                                         interm_bytes)),
        cost_estimate=cost_main,
    )(q_p, w_qv, b_qv, gamma_q, beta_q, skn_p, sv_p)

    # slice padded rows/columns back to the true shapes
    return (q_proto_p[:n_queries, :outdim], c_proto_p[:n_queries, :outdim])

    # TODO(synk): eval (non-training) branch returning (q_prototype,
    # support_set_vs) is not wired through this wrapper; only the training-mode
    # attention path is implemented.


def _reference_forward(support_set, queries, params, outdim):
    """Pure-JAX f32 reference mirroring the PyTorch training branch."""
    def linear(x, w, b):
        return x @ w + b

    def ln(x, g, b, eps=1e-5):
        mu = jnp.mean(x, axis=-1, keepdims=True)
        var = jnp.mean((x - mu) ** 2, axis=-1, keepdims=True)
        return (x - mu) / jnp.sqrt(var + eps) * g + b

    sv = linear(support_set, params["wv"], params["bv"])
    qv = linear(queries, params["wv"], params["bv"])
    sk = ln(linear(support_set, params["wk"], params["bk"]),
            params["ln_gamma"], params["ln_beta"])
    qq = ln(linear(queries, params["wq"], params["bq"]),
            params["ln_gamma"], params["ln_beta"])
    scores = (qq @ sk.T) / math.pow(outdim, 0.5)
    aff = jax.nn.softmax(scores, axis=1)
    return qv, aff @ sv


def init_params(key, d_model, outdim):
    """Deterministic parameter init (shapes match nn.Linear / nn.LayerNorm)."""
    ks = jax.random.split(key, 6)
    bound = 1.0 / math.sqrt(d_model)

    def uni(k, shape):
        return jax.random.uniform(k, shape, jnp.float32, -bound, bound)

    return {
        # weights stored pre-transposed: [d_model, outdim]
        "wq": uni(ks[0], (d_model, outdim)),
        "bq": uni(ks[1], (1, outdim)),
        "wk": uni(ks[2], (d_model, outdim)),
        "bk": uni(ks[3], (1, outdim)),
        "wv": uni(ks[4], (d_model, outdim)),
        "bv": uni(ks[5], (1, outdim)),
        # LayerNorm affine params (PyTorch default init: ones / zeros)
        "ln_gamma": jnp.ones((1, outdim), jnp.float32),
        "ln_beta": jnp.zeros((1, outdim), jnp.float32),
    }


if __name__ == "__main__":
    d_model = 32
    outdim = 32
    n_support = 8
    n_queries = 8

    key = jax.random.PRNGKey(0)
    k_sup, k_qry, k_par = jax.random.split(key, 3)

    support_set = jax.random.normal(k_sup, (n_support, d_model), jnp.float32)
    queries = jax.random.normal(k_qry, (n_queries, d_model), jnp.float32)
    params = init_params(k_par, d_model, outdim)

    q_proto, class_proto = aen_forward(support_set, queries, params, outdim)
    q_proto = jax.block_until_ready(q_proto)
    class_proto = jax.block_until_ready(class_proto)

    # sanity check against pure-JAX f32 reference (bf16 matmuls -> loose tol)
    q_ref, c_ref = _reference_forward(support_set, queries, params, outdim)
    assert q_proto.shape == (n_queries, outdim)
    assert class_proto.shape == (n_queries, outdim)
    assert float(jnp.max(jnp.abs(q_proto - q_ref))) < 5e-2
    assert float(jnp.max(jnp.abs(class_proto - c_ref))) < 5e-2

    print("KERNEL_OK")
</pallas_src>

<mosaic_0001>
module attributes {stable_mosaic.version = 11 : i64} {
  func.func @support_kernel(%arg0: i32, %arg1: memref<8x128xbf16, #tpu.memory_space<vmem>>, %arg2: memref<128x256xbf16, #tpu.memory_space<vmem>>, %arg3: memref<1x256xf32, #tpu.memory_space<vmem>>, %arg4: memref<1x128xf32, #tpu.memory_space<vmem>>, %arg5: memref<1x128xf32, #tpu.memory_space<vmem>>, %arg6: memref<8x128xbf16, #tpu.memory_space<vmem>>, %arg7: memref<8x128xbf16, #tpu.memory_space<vmem>>) attributes {dimension_semantics = [#tpu.dimension_semantics<arbitrary>], iteration_bounds = array<i64: 1>, scalar_prefetch = 0 : i64, scratch_operands = 0 : i64, tpu.core_type = #tpu.core_type<tc>, window_params = [{pipeline_mode = #tpu.pipeline_mode<synchronous>, transform_indices = @transform_0, window_bounds = array<i64: 8, 128>}, {pipeline_mode = #tpu.pipeline_mode<synchronous>, transform_indices = @transform_1, window_bounds = array<i64: 128, 256>}, {pipeline_mode = #tpu.pipeline_mode<synchronous>, transform_indices = @transform_2, window_bounds = array<i64: 1, 256>}, {pipeline_mode = #tpu.pipeline_mode<synchronous>, transform_indices = @transform_3, window_bounds = array<i64: 1, 128>}, {pipeline_mode = #tpu.pipeline_mode<synchronous>, transform_indices = @transform_4, window_bounds = array<i64: 1, 128>}, {pipeline_mode = #tpu.pipeline_mode<synchronous>, transform_indices = @transform_5, window_bounds = array<i64: 8, 128>}, {pipeline_mode = #tpu.pipeline_mode<synchronous>, transform_indices = @transform_6, window_bounds = array<i64: 8, 128>}]} {
    %c0 = arith.constant 0 : index
    %c0_0 = arith.constant 0 : index
    %0 = vector.load %arg1[%c0, %c0_0] : memref<8x128xbf16, #tpu.memory_space<vmem>>, vector<8x128xbf16>
    %c0_1 = arith.constant 0 : index
    %c0_2 = arith.constant 0 : index
    %1 = vector.load %arg2[%c0_1, %c0_2] : memref<128x256xbf16, #tpu.memory_space<vmem>>, vector<128x256xbf16>
    %cst = arith.constant dense<0.000000e+00> : vector<8x256xf32>
    %2 = tpu.matmul %0, %1, %cst {dimension_numbers = #tpu.dot_dimension_numbers<[1], [0], [0], [1], [0, 0, 1, 1], [], []>} : vector<8x128xbf16>, vector<128x256xbf16>, vector<8x256xf32> -> vector<8x256xf32>
    %c0_3 = arith.constant 0 : index
    %c0_4 = arith.constant 0 : index
    %3 = vector.load %arg3[%c0_3, %c0_4] : memref<1x256xf32, #tpu.memory_space<vmem>>, vector<1x256xf32>
    %4 = vector.broadcast %3 : vector<1x256xf32> to vector<8x256xf32>
    %5 = arith.addf %2, %4 : vector<8x256xf32>
    %6 = vector.extract_strided_slice %5 {offsets = [0, 0], sizes = [8, 128], strides = [1, 1]} : vector<8x256xf32> to vector<8x128xf32>
    %7 = vector.extract_strided_slice %5 {offsets = [0, 128], sizes = [8, 128], strides = [1, 1]} : vector<8x256xf32> to vector<8x128xf32>
    %8 = arith.truncf %7 : vector<8x128xf32> to vector<8x128xbf16>
    %c0_5 = arith.constant 0 : index
    %c0_6 = arith.constant 0 : index
    %9 = vector.load %arg7[%c0_5, %c0_6] : memref<8x128xbf16, #tpu.memory_space<vmem>>, vector<8x128xbf16>
    tpu.vector_store %arg7[%c0_5, %c0_6], %8 {strides = array<i32>} : memref<8x128xbf16, #tpu.memory_space<vmem>>, vector<8x128xbf16>,
    %c0_7 = arith.constant 0 : index
    %c0_8 = arith.constant 0 : index
    %10 = vector.load %arg4[%c0_7, %c0_8] : memref<1x128xf32, #tpu.memory_space<vmem>>, vector<1x128xf32>
    %c0_9 = arith.constant 0 : index
    %c0_10 = arith.constant 0 : index
    %11 = vector.load %arg5[%c0_9, %c0_10] : memref<1x128xf32, #tpu.memory_space<vmem>>, vector<1x128xf32>
    %12 = tpu.iota {dimensions = array<i32: 1>} : vector<1x128xi32>
    %c32_i32 = arith.constant 32 : i32
    %13 = vector.broadcast %c32_i32 : i32 to vector<1x128xi32>
    %14 = arith.cmpi slt, %12, %13 : vector<1x128xi32>
    %cst_11 = arith.constant dense<0.000000e+00> : vector<8xf32>
    %15 = vector.multi_reduction <add>, %6, %cst_11 [1] : vector<8x128xf32> to vector<8xf32>
    %16 = vector.shape_cast %15 : vector<8xf32> to vector<8x1xf32>
    %cst_12 = arith.constant 3.125000e-02 : f32
    %17 = vector.broadcast %cst_12 : f32 to vector<8x1xf32>
    %18 = arith.mulf %16, %17 : vector<8x1xf32>
    %19 = vector.broadcast %18 : vector<8x1xf32> to vector<8x128xf32>
    %20 = arith.subf %6, %19 : vector<8x128xf32>
    %21 = arith.mulf %20, %20 : vector<8x128xf32>
    %cst_13 = arith.constant 0.000000e+00 : f32
    %22 = vector.shape_cast %14 : vector<1x128xi1> to vector<1x128xi1>
    %23 = vector.broadcast %22 : vector<1x128xi1> to vector<8x128xi1>
    %24 = vector.broadcast %cst_13 : f32 to vector<8x128xf32>
    %25 = arith.select %23, %21, %24 : vector<8x128xi1>, vector<8x128xf32>
    %cst_14 = arith.constant dense<0.000000e+00> : vector<8xf32>
    %26 = vector.multi_reduction <add>, %25, %cst_14 [1] : vector<8x128xf32> to vector<8xf32>
    %27 = vector.shape_cast %26 : vector<8xf32> to vector<8x1xf32>
    %cst_15 = arith.constant 3.125000e-02 : f32
    %28 = vector.broadcast %cst_15 : f32 to vector<8x1xf32>
    %29 = arith.mulf %27, %28 : vector<8x1xf32>
    %cst_16 = arith.constant 9.99999974E-6 : f32
    %30 = vector.broadcast %cst_16 : f32 to vector<8x1xf32>
    %31 = arith.addf %29, %30 : vector<8x1xf32>
    %32 = math.rsqrt %31 : vector<8x1xf32>
    %33 = vector.broadcast %32 : vector<8x1xf32> to vector<8x128xf32>
    %34 = arith.mulf %20, %33 : vector<8x128xf32>
    %35 = vector.broadcast %10 : vector<1x128xf32> to vector<8x128xf32>
    %36 = arith.mulf %34, %35 : vector<8x128xf32>
    %37 = vector.broadcast %11 : vector<1x128xf32> to vector<8x128xf32>
    %38 = arith.addf %36, %37 : vector<8x128xf32>
    %39 = arith.truncf %38 : vector<8x128xf32> to vector<8x128xbf16>
    %c0_17 = arith.constant 0 : index
    %c0_18 = arith.constant 0 : index
    %40 = vector.load %arg6[%c0_17, %c0_18] : memref<8x128xbf16, #tpu.memory_space<vmem>>, vector<8x128xbf16>
    tpu.vector_store %arg6[%c0_17, %c0_18], %39 {strides = array<i32>} : memref<8x128xbf16, #tpu.memory_space<vmem>>, vector<8x128xbf16>,
    return
  }
  func.func @transform_0(%arg0: i32) -> (i32, i32) {
    %c0_i32 = arith.constant 0 : i32
    %c0_i32_0 = arith.constant 0 : i32
    %c0_i32_1 = arith.constant 0 : i32
    return %c0_i32, %c0_i32_0 : i32, i32
  }
  func.func @transform_1(%arg0: i32) -> (i32, i32) {
    %c0_i32 = arith.constant 0 : i32
    %c0_i32_0 = arith.constant 0 : i32
    %c0_i32_1 = arith.constant 0 : i32
    return %c0_i32, %c0_i32_0 : i32, i32
  }
  func.func @transform_2(%arg0: i32) -> (i32, i32) {
    %c0_i32 = arith.constant 0 : i32
    %c0_i32_0 = arith.constant 0 : i32
    %c0_i32_1 = arith.constant 0 : i32
    return %c0_i32, %c0_i32_0 : i32, i32
  }
  func.func @transform_3(%arg0: i32) -> (i32, i32) {
    %c0_i32 = arith.constant 0 : i32
    %c0_i32_0 = arith.constant 0 : i32
    %c0_i32_1 = arith.constant 0 : i32
    return %c0_i32, %c0_i32_0 : i32, i32
  }
  func.func @transform_4(%arg0: i32) -> (i32, i32) {
    %c0_i32 = arith.constant 0 : i32
    %c0_i32_0 = arith.constant 0 : i32
    %c0_i32_1 = arith.constant 0 : i32
    return %c0_i32, %c0_i32_0 : i32, i32
  }
  func.func @transform_5(%arg0: i32) -> (i32, i32) {
    %c0_i32 = arith.constant 0 : i32
    %c0_i32_0 = arith.constant 0 : i32
    %c0_i32_1 = arith.constant 0 : i32
    return %c0_i32, %c0_i32_0 : i32, i32
  }
  func.func @transform_6(%arg0: i32) -> (i32, i32) {
    %c0_i32 = arith.constant 0 : i32
    %c0_i32_0 = arith.constant 0 : i32
    %c0_i32_1 = arith.constant 0 : i32
    return %c0_i32, %c0_i32_0 : i32, i32
  }
}

</mosaic_0001>

<bundles_post_ra>
// kernel: tpu_custom_call.1
= control target key start
LH: loop header
LB: loop body
LE: loop exit
PB: predicated region body
PF: predicated region fallthrough
CT: control target
= control target key end

     0   :  { %12 = vsyncpa [#allocation3], 0  ;;  %s521_s0 = inlined_call_operand.hbm [shape: bf16[8,128], index: 0, kind: input, shape index: {}]   ;;  %s522_s1 = inlined_call_operand.hbm [shape: bf16[128,256], index: 1, kind: input, shape index: {}]   ;;  %s523_s2 = inlined_call_operand.vmem [shape: f32[1,256], index: 2, kind: input, shape index: {}]   ;;  %s524_s3 = inlined_call_operand.vmem [shape: f32[1,128], index: 3, kind: input, shape index: {}]   ;;  %s525_s4 = inlined_call_operand.vmem [shape: f32[1,128], index: 4, kind: input, shape index: {}]   ;;  %s526_s5 = inlined_call_operand.hbm [shape: bf16[8,128], index: 5, kind: output, shape index: {0}]   ;;  %s527_s6 = inlined_call_operand.hbm [shape: bf16[8,128], index: 6, kind: output, shape index: {1}]  }
   0x1   :  { %13 = vsyncpa [#allocation6], 0 }
   0x2   :  { %14 = vsyncpa [#allocation4], 0 }
   0x3   :  { %15 = vsyncpa [#allocation9], 0  ;;  %s415_s21 = smov [#allocation2]   ;;  %s416_s23 = smov [#allocation5]  }
   0x4   :  { %s22_s22 = sshll.u32 %s415_s21, 4  ;;  %s31_s24 = sshll.u32 %s416_s23, 4  ;;  %s23_s22 = int_to_ptr.vmem [resolvable:$true] %s22_s22  ;;  %s457_s24 = int_to_ptr.vmem [resolvable:$true] %s31_s24 }
   0x5   :  { %s319_s27 = scalar_lea.hbm %s521_s0, 64 }
   0x6   :  { %p320_p0 = scmp.ne.s32.totalorder %s521_s0, %s319_s27  ;;  %p323_p1 = scmp.lt.u32.totalorder %s319_s27, %s521_s0 }
   0x8   :  { %p325_p2 = pnand %p323_p1, %p320_p0 }
   0xa   :  { %328 = shalt.err (!%p325_p2)
}
   0xb   :  { %s329_s8 = scalar_lea.vmem %s23_s22, 64  ;;  %p334_p4 = scmp.lt.s32.totalorder %s23_s22, %s23_s22 }
   0xc   :  { %p330_p3 = scmp.ne.s32.totalorder %s23_s22, %s329_s8  ;;  %p335_p5 = scmp.lt.s32.totalorder %s329_s8, %s329_s8 }
   0xe   :  { %p336_p6 = por %p335_p5, %p334_p4 }
  0x10   :  { %p337_p7 = pnand %p336_p6, %p330_p3 }
  0x12   :  { %340 = shalt.err (!%p337_p7)
}
  0x13   :  { %25 = dma.hbm_to_vmem [thread:$0]  %s521_s0, 64, %s23_s22, [#allocation3]  }
  0x14   :  { %s341_s13 = scalar_lea.hbm %s522_s1, 2048 }
  0x15   :  { %p342_p8 = scmp.ne.s32.totalorder %s522_s1, %s341_s13  ;;  %p345_p9 = scmp.lt.u32.totalorder %s341_s13, %s522_s1 }
  0x17   :  { %p347_p10 = pnand %p345_p9, %p342_p8 }
  0x19   :  { %350 = shalt.err (!%p347_p10)
}
  0x1a   :  { %s351_s18 = scalar_lea.vmem %s457_s24, 2048  ;;  %p356_p12 = scmp.lt.s32.totalorder %s457_s24, %s457_s24 }
  0x1b   :  { %p352_p11 = scmp.ne.s32.totalorder %s457_s24, %s351_s18  ;;  %p357_p13 = scmp.lt.s32.totalorder %s351_s18, %s351_s18 }
  0x1d   :  { %p358_p0 = por %p357_p13, %p356_p12 }
  0x1f   :  { %p359_p1 = pnand %p358_p0, %p352_p11 }
  0x21   :  { %362 = shalt.err (!%p359_p1)
}
  0x22   :  { %s417_s0 = smov 128   ;;  %s418_s19 = smov 8  }
  0x23   :  { %37 = dma.hbm_to_vmem [thread:$0]  %s522_s1, 2048, %s457_s24, [#allocation6], %s417_s0, %s417_s0, %s418_s19  }
  0x24   :  { %407 = dma.done.wait [#allocation3], 64  }
  0x25   :  { %408 = vsyncadd [#allocation3], 4294967232 }
  0x26   :  { %409 = dma.done.wait [#allocation6], 2048  }
  0x27   :  { %410 = vsyncadd [#allocation6], 4294965248  ;;  %v419_v0 = vmov 0   ;;  %v293_v1 = vld [vmem:[#allocation5 + $0x4] ss:$8 sps:$4 sm:$0xff]   ;;  %v70_v18 = vlaneseq }
  0x28   :  { %192 = vmatprep.mubr.bf16.mxu0 %v419_v0  ;;  %v295_v2 = vld [vmem:[#allocation5] ss:$8 sps:$4 sm:$0xff]   ;;  %160 = vmatprep.subr.bf16.mxu0 %v293_v1  ;;  %v296_v3 = vld [vmem:[#allocation5 + $0x14] ss:$8 sps:$4 sm:$0xff]   ;;  %v298_v4 = vld [vmem:[#allocation5 + $0x10] ss:$8 sps:$4 sm:$0xff]  }
  0x29   :  { %161 = vmatpush1.bf16.msra.mxu0 %v295_v2  ;;  %v299_v5 = vld [vmem:[#allocation5 + $0x24] ss:$8 sps:$4 sm:$0xff]   ;;  %v301_v6 = vld [vmem:[#allocation5 + $0x20] ss:$8 sps:$4 sm:$0xff]   ;;  %v302_v7 = vld [vmem:[#allocation5 + $0x34] ss:$8 sps:$4 sm:$0xff]  }
  0x2a   :  { %162 = vmatprep.subr.bf16.mxu0 %v296_v3  ;;  %v304_v8 = vld [vmem:[#allocation5 + $0x30] ss:$8 sps:$4 sm:$0xff]   ;;  %v305_v9 = vld [vmem:[#allocation5 + $0x44] ss:$8 sps:$4 sm:$0xff]   ;;  %v307_v10 = vld [vmem:[#allocation5 + $0x40] ss:$8 sps:$4 sm:$0xff]  }
  0x2b   :  { %v308_v11 = vld [vmem:[#allocation5 + $0x54] ss:$8 sps:$4 sm:$0xff]   ;;  %v310_v12 = vld [vmem:[#allocation5 + $0x50] ss:$8 sps:$4 sm:$0xff]   ;;  %v311_v13 = vld [vmem:[#allocation5 + $0x64] ss:$8 sps:$4 sm:$0xff]  }
  0x2c   :  { %v313_v14 = vld [vmem:[#allocation5 + $0x60] ss:$8 sps:$4 sm:$0xff]   ;;  %v314_v15 = vld [vmem:[#allocation5 + $0x74] ss:$8 sps:$4 sm:$0xff]   ;;  %v316_v16 = vld [vmem:[#allocation5 + $0x70] ss:$8 sps:$4 sm:$0xff]  }
  0x2d   :  { %163 = vmatpush1.bf16.msra.mxu0 %v298_v4  ;;  %v51_v17 = vld [vmem:[#allocation2] sm:$0xf]  ;;  %v71_v19 = vshrl.u32 %v70_v18, 7  ;;  %v206_v33 = vand.u32 127, %v70_v18 }
  0x2e   :  { %164 = vmatprep.subr.bf16.mxu0 %v299_v5  ;;  %v68_v21 = vld [vmem:[%s523_s2] sm:$0x3]  ;;  %s420_s2 = smov [#allocation8]  }
  0x2f   :  { %v72_v20 = vsub.s32 0, %v71_v19  ;;  %v76_v22 = vsub.s32 1, %v71_v19  ;;  %vm207_vm0 = vcmp.lt.s32.totalorder %v206_v33, 32  ;;  %s254_s23 = sshll.u32 %s420_s2, 4  ;;  %s255_s23 = int_to_ptr.vmem [resolvable:$true] %s254_s23 }
  0x30   :  { %s363_s24 = scalar_lea.vmem %s255_s23, 64  ;;  %p368_p3 = scmp.lt.s32.totalorder %s255_s23, %s255_s23 }
  0x31   :  { %165 = vmatpush1.bf16.msra.mxu0 %v301_v6  ;;  %v73_v23 = vrot.slane %v68_v21, %v72_v20  ;;  %v77_v24 = vrot.slane %v68_v21, %v76_v22  ;;  %p364_p2 = scmp.ne.s32.totalorder %s255_s23, %s363_s24  ;;  %p369_p4 = scmp.lt.s32.totalorder %s363_s24, %s363_s24 }
  0x32   :  { %166 = vmatprep.subr.bf16.mxu0 %v302_v7 }
  0x33   :  { %p370_p5 = por %p369_p4, %p368_p3 }
  0x35   :  { %167 = vmatpush1.bf16.msra.mxu0 %v304_v8  ;;  %p371_p6 = pnand %p370_p5, %p364_p2 }
  0x36   :  { %168 = vmatprep.subr.bf16.mxu0 %v305_v9 }
  0x39   :  { %169 = vmatpush1.bf16.msra.mxu0 %v307_v10 }
  0x3a   :  { %170 = vmatprep.subr.bf16.mxu0 %v308_v11 }
  0x3d   :  { %171 = vmatpush1.bf16.msra.mxu0 %v310_v12 }
  0x3e   :  { %172 = vmatprep.subr.bf16.mxu0 %v311_v13 }
  0x41   :  { %173 = vmatpush1.bf16.msra.mxu0 %v313_v14 }
  0x42   :  { %174 = vmatprep.subr.bf16.mxu0 %v314_v15 }
  0x45   :  { %175 = vmatpush1.bf16.msra.mxu0 %v316_v16 }
  0x48   :  { %193 = vmatmul.mubr.bf16.vlgmr.msra.gmra.mrb[0].mxu0 %v51_v17 }
 0x11b   :  { %v194_v25 = vpop.f32.mrb[0].mxu0 }
 0x11c   :  { %v195_v26 = vadd.f32 %v194_v25, %v73_v23  ;;  %v196_v27 = vpop.f32.mrb[1].mxu0 }
 0x11d   :  { %v197_v28 = vadd.f32 %v196_v27, %v77_v24  ;;  %v198_v29 = vpop.f32.mrb[2].mxu0 }
 0x11e   :  { %v199_v30 = vpop.f32.mrb[3].mxu0  ;;  %208 = vadd.xlane.f32.xlu0 %v195_v26 }
 0x11f   :  { %v201_v31 = vpack.c.bf16 %v197_v28, %v197_v28 }
 0x121   :  { %202 = vst [vmem:[#allocation8] sm:$0xf] %v201_v31 }
 0x1ab   :  { %v209_v32 = vpop.xlane.xlu0 %208 }
 0x1ac   :  { %v210_v34 = vmul.f32 0.03125, %v209_v32 }
 0x1ae   :  { %v211_v35 = vsub.f32 %v195_v26, %v210_v34 }
 0x1b0   :  { %v212_v36 = vmul.f32 %v211_v35, %v211_v35 }
 0x1b2   :  { %v215_v37 = vsel %vm207_vm0, %v212_v36, 0.0 }
 0x1b3   :  { %216 = vadd.xlane.f32.xlu0 %v215_v37 }
 0x1b4   :  { %374 = shalt.err (!%p371_p6)
}
 0x1b5   :  { %s375_s27 = scalar_lea.hbm %s527_s6, 64 }
 0x1b6   :  { %p376_p7 = scmp.ne.s32.totalorder %s527_s6, %s375_s27  ;;  %p379_p8 = scmp.lt.u32.totalorder %s375_s27, %s527_s6 }
 0x1b8   :  { %p381_p9 = pnand %p379_p8, %p376_p7 }
 0x1ba   :  { %384 = shalt.err (!%p381_p9)
}
 0x1bb   :  { %257 = dma.vmem_to_hbm [thread:$0]  %s255_s23, 64, %s527_s6, [#allocation9]   ;;  %v284_v42 = vld [vmem:[%s524_s3] ss:$0 sm:$0xff] }
 0x1bc   :  { %v285_v44 = vld [vmem:[%s525_s4] ss:$0 sm:$0xff]  ;;  %s421_s14 = smov [#allocation7]  }
 0x1bd   :  { %s244_s15 = sshll.u32 %s421_s14, 4  ;;  %s245_s15 = int_to_ptr.vmem [resolvable:$true] %s244_s15 }
 0x1be   :  { %s385_s6 = scalar_lea.vmem %s245_s15, 64  ;;  %p390_p11 = scmp.lt.s32.totalorder %s245_s15, %s245_s15 }
 0x1bf   :  { %p386_p10 = scmp.ne.s32.totalorder %s245_s15, %s385_s6  ;;  %p391_p12 = scmp.lt.s32.totalorder %s385_s6, %s385_s6 }
 0x1c1   :  { %p392_p13 = por %p391_p12, %p390_p11 }
 0x1c3   :  { %p393_p0 = pnand %p392_p13, %p386_p10 }
 0x240   :  { %v217_v38 = vpop.xlane.xlu0 %216 }
 0x241   :  { %v218_v39 = vmul.f32 0.03125, %v217_v38 }
 0x243   :  { %v219_v40 = vadd.f32 1e-05, %v218_v39 }
 0x245   :  { %317 = vrsqrt.f32 %v219_v40 }
 0x24f   :  { %v318_v41 = vpop.eup %317 }
 0x250   :  { %v221_v43 = vmul.f32 %v318_v41, %v211_v35 }
 0x252   :  { %v228_v45 = vmul.f32 %v284_v42, %v221_v43 }
 0x254   :  { %v235_v46 = vadd.f32 %v285_v44, %v228_v45 }
 0x256   :  { %v236_v47 = vpack.c.bf16 %v235_v46, %v235_v46 }
 0x258   :  { %237 = vst [vmem:[#allocation7] sm:$0xf] %v236_v47 }
 0x259   :  { %396 = shalt.err (!%p393_p0)
}
 0x25a   :  { %s397_s17 = scalar_lea.hbm %s526_s5, 64 }
 0x25b   :  { %p398_p1 = scmp.ne.s32.totalorder %s526_s5, %s397_s17  ;;  %p401_p2 = scmp.lt.u32.totalorder %s397_s17, %s526_s5 }
 0x25d   :  { %p403_p3 = pnand %p401_p2, %p398_p1 }
 0x25f   :  { %406 = shalt.err (!%p403_p3)
}
 0x260   :  { %247 = dma.vmem_to_hbm [thread:$0]  %s245_s15, 64, %s526_s5, [#allocation4]  }
 0x261   :  { %411 = dma.done.wait [#allocation4], 64  }
 0x262   :  { %412 = vsyncadd [#allocation4], 4294967232 }
 0x263   :  { %413 = dma.done.wait [#allocation9], 64  }
 0x264   :  { %414 = vsyncadd [#allocation9], 4294967232 }
 0x265   :  { %264 = vsyncpa [#allocation3], 1 }
 0x266   :  { %265 = vsyncpa [#allocation6], 1 }
 0x267   :  { %266 = vsyncpa [#allocation4], 1 }
 0x268   :  { %267 = vsyncpa [#allocation9], 1 }

</bundles_post_ra>
